<compile_context>
chip_gen: v7x
topology: tpu7x:2x2x1
jax: 0.10.0
libtpu: 0.0.40
codegen_flags: <defaults>
</compile_context>

<pallas_src>
import jax
import jax.numpy as jnp
import numpy as np
from jax.experimental import pallas as pl
from jax.experimental.pallas import tpu as pltpu

# --- model dims (from Hyperparameters: rows=7, columns=7, hidden_size=64) ---
ROWS, COLS = 7, 7
STATE_SIZE = ROWS * COLS * 2     # 98
FEAT_PAD = 128                   # lane-dense padded input feature dim
HIDDEN = 64
OUT = 1
DEFAULT_TILE_B = 512             # batch tile: multiple of 8, ~0.5 MiB double-buffered (fits v7x VMEM)


def _round_up(n, m):
    return ((n + m - 1) // m) * m


def critic_kernel(x_ref, w1_ref, b1_ref, w2_ref, b2_ref, w3_ref, b3_ref, o_ref):
    """One batch tile of the full forward pass (weights are VMEM-resident)."""
    x = x_ref[...]                                                        # (TB, 128)
    h1 = jnp.dot(x, w1_ref[...], preferred_element_type=jnp.float32) + b1_ref[...]
    h1 = jnp.maximum(h1, 0.0)                                             # ReLU (TB, 64)
    h2 = jnp.dot(h1, w2_ref[...], preferred_element_type=jnp.float32) + b2_ref[...]
    h2 = jnp.maximum(h2, 0.0)                                             # ReLU (TB, 64)
    # fc3 has out_features=1: do it as VPU multiply + lane reduce (XLU) instead of a
    # 1-column MXU matmul, and add the SMEM scalar bias.
    o_ref[...] = jnp.sum(h2 * w3_ref[...], axis=-1, keepdims=True) + b3_ref[0, 0]


def critic_forward(x, params, tile_b=DEFAULT_TILE_B):
    """x: (B, 2, 7, 7) float32 (NCHW).  Returns (B, 1) float32."""
    B = x.shape[0]
    w1, b1, w2, b2, w3, b3 = params

    x_flat = x.reshape(B, -1).astype(jnp.float32)                         # == torch .view(B, -1)
    # lane-dense feature padding: zero input cols x zero w1 rows -> identical result
    x_pad = jnp.pad(x_flat, ((0, 0), (0, FEAT_PAD - STATE_SIZE)))         # (B, 128)
    w1_pad = jnp.pad(w1, ((0, FEAT_PAD - STATE_SIZE), (0, 0)))            # (128, 64)
    w3_row = w3.reshape(1, HIDDEN)                                        # (1, 64) for VPU reduce
    b3_sc = b3.reshape(1, 1)                                              # SMEM scalar

    # batch tiling: pad B up to a multiple of TILE_B so every block is full
    TILE_B = min(_round_up(max(B, 1), 8), _round_up(tile_b, 8))
    Bp = _round_up(B, TILE_B)
    if Bp != B:
        x_pad = jnp.pad(x_pad, ((0, Bp - B), (0, 0)))
    num_tiles = Bp // TILE_B

    out = pl.pallas_call(
        critic_kernel,
        out_shape=jax.ShapeDtypeStruct((Bp, OUT), jnp.float32),
        grid=(num_tiles,),
        in_specs=[
            pl.BlockSpec((TILE_B, FEAT_PAD), lambda i: (i, 0)),           # x streams per tile
            pl.BlockSpec((FEAT_PAD, HIDDEN), lambda i: (0, 0)),           # w1 resident
            pl.BlockSpec((1, HIDDEN), lambda i: (0, 0)),                  # b1 resident
            pl.BlockSpec((HIDDEN, HIDDEN), lambda i: (0, 0)),             # w2 resident
            pl.BlockSpec((1, HIDDEN), lambda i: (0, 0)),                  # b2 resident
            pl.BlockSpec((1, HIDDEN), lambda i: (0, 0)),                  # w3 row resident
            pl.BlockSpec(memory_space=pltpu.MemorySpace.SMEM),            # b3 scalar in SMEM
        ],
        out_specs=pl.BlockSpec((TILE_B, OUT), lambda i: (i, 0)),
        compiler_params=pltpu.CompilerParams(
            dimension_semantics=("parallel",)),                           # megacore on v7x
    )(x_pad, w1_pad, b1, w2, b2, w3_row, b3_sc)
    return out[:B]


def init_params(key):
    """Deterministic init mimicking nn.Linear's uniform(-1/sqrt(fan_in), 1/sqrt(fan_in)).
    Weights are stored transposed: (in_features, out_features)."""
    def linear(key, fan_in, fan_out):
        kw, kb = jax.random.split(key)
        bound = 1.0 / np.sqrt(fan_in)
        w = jax.random.uniform(kw, (fan_in, fan_out), jnp.float32, -bound, bound)
        b = jax.random.uniform(kb, (1, fan_out), jnp.float32, -bound, bound)
        return w, b

    k1, k2, k3 = jax.random.split(key, 3)
    w1, b1 = linear(k1, STATE_SIZE, HIDDEN)
    w2, b2 = linear(k2, HIDDEN, HIDDEN)
    w3, b3 = linear(k3, HIDDEN, OUT)
    return (w1, b1, w2, b2, w3, b3)


def reference_forward(x, params):
    """Pure-JAX reference of the PyTorch forward."""
    w1, b1, w2, b2, w3, b3 = params
    h = x.reshape(x.shape[0], -1)
    h = jnp.maximum(h @ w1 + b1, 0.0)
    h = jnp.maximum(h @ w2 + b2, 0.0)
    return h @ w3 + b3


if __name__ == "__main__":
    key = jax.random.PRNGKey(0)
    k_params, k_x = jax.random.split(key)

    params = init_params(k_params)
    B = 8
    x = jax.random.normal(k_x, (B, 2, ROWS, COLS), jnp.float32)  # NCHW pixel obs

    out = critic_forward(x, params)
    out = jax.block_until_ready(out)

    ref = reference_forward(x, params)
    np.testing.assert_allclose(np.asarray(out), np.asarray(ref), rtol=1e-5, atol=1e-5)
    assert out.shape == (B, 1)

    # also exercise a batch that is not a multiple of the tile / 8
    B2 = 19
    x2 = jax.random.normal(jax.random.PRNGKey(7), (B2, 2, ROWS, COLS), jnp.float32)
    out2 = jax.block_until_ready(critic_forward(x2, params))
    np.testing.assert_allclose(np.asarray(out2), np.asarray(reference_forward(x2, params)),
                               rtol=1e-5, atol=1e-5)
    assert out2.shape == (B2, 1)

    print("KERNEL_OK")
</pallas_src>

<mosaic_0001>
module attributes {stable_mosaic.version = 11 : i64} {
  func.func @critic_kernel(%arg0: i32, %arg1: memref<8x128xf32, #tpu.memory_space<vmem>>, %arg2: memref<128x64xf32, #tpu.memory_space<vmem>>, %arg3: memref<1x64xf32, #tpu.memory_space<vmem>>, %arg4: memref<64x64xf32, #tpu.memory_space<vmem>>, %arg5: memref<1x64xf32, #tpu.memory_space<vmem>>, %arg6: memref<1x64xf32, #tpu.memory_space<vmem>>, %arg7: memref<1x1xf32, #tpu.memory_space<smem>>, %arg8: memref<8x1xf32, #tpu.memory_space<vmem>>) attributes {dimension_semantics = [#tpu.dimension_semantics<parallel>], iteration_bounds = array<i64: 1>, scalar_prefetch = 0 : i64, scratch_operands = 0 : i64, tpu.core_type = #tpu.core_type<tc>, window_params = [{transform_indices = @transform_0, window_bounds = array<i64: 8, 128>}, {pipeline_mode = #tpu.pipeline_mode<synchronous>, transform_indices = @transform_1, window_bounds = array<i64: 128, 64>}, {pipeline_mode = #tpu.pipeline_mode<synchronous>, transform_indices = @transform_2, window_bounds = array<i64: 1, 64>}, {pipeline_mode = #tpu.pipeline_mode<synchronous>, transform_indices = @transform_3, window_bounds = array<i64: 64, 64>}, {pipeline_mode = #tpu.pipeline_mode<synchronous>, transform_indices = @transform_4, window_bounds = array<i64: 1, 64>}, {pipeline_mode = #tpu.pipeline_mode<synchronous>, transform_indices = @transform_5, window_bounds = array<i64: 1, 64>}, {transform_indices = @transform_6, window_bounds = array<i64: 1, 1>}, {transform_indices = @transform_7, window_bounds = array<i64: 8, 1>}]} {
    %c0 = arith.constant 0 : index
    %c0_0 = arith.constant 0 : index
    %0 = vector.load %arg1[%c0, %c0_0] : memref<8x128xf32, #tpu.memory_space<vmem>>, vector<8x128xf32>
    %c0_1 = arith.constant 0 : index
    %c0_2 = arith.constant 0 : index
    %1 = vector.load %arg2[%c0_1, %c0_2] : memref<128x64xf32, #tpu.memory_space<vmem>>, vector<128x64xf32>
    %cst = arith.constant dense<0.000000e+00> : vector<8x64xf32>
    %2 = tpu.matmul %0, %1, %cst {dimension_numbers = #tpu.dot_dimension_numbers<[1], [0], [0], [1], [0, 0, 1, 1], [], []>} : vector<8x128xf32>, vector<128x64xf32>, vector<8x64xf32> -> vector<8x64xf32>
    %c0_3 = arith.constant 0 : index
    %c0_4 = arith.constant 0 : index
    %3 = vector.load %arg3[%c0_3, %c0_4] : memref<1x64xf32, #tpu.memory_space<vmem>>, vector<1x64xf32>
    %4 = vector.broadcast %3 : vector<1x64xf32> to vector<8x64xf32>
    %5 = arith.addf %2, %4 : vector<8x64xf32>
    %cst_5 = arith.constant 0.000000e+00 : f32
    %6 = vector.broadcast %cst_5 : f32 to vector<8x64xf32>
    %7 = arith.maximumf %5, %6 : vector<8x64xf32>
    %c0_6 = arith.constant 0 : index
    %c0_7 = arith.constant 0 : index
    %8 = vector.load %arg4[%c0_6, %c0_7] : memref<64x64xf32, #tpu.memory_space<vmem>>, vector<64x64xf32>
    %cst_8 = arith.constant dense<0.000000e+00> : vector<8x64xf32>
    %9 = tpu.matmul %7, %8, %cst_8 {dimension_numbers = #tpu.dot_dimension_numbers<[1], [0], [0], [1], [0, 0, 1, 1], [], []>} : vector<8x64xf32>, vector<64x64xf32>, vector<8x64xf32> -> vector<8x64xf32>
    %c0_9 = arith.constant 0 : index
    %c0_10 = arith.constant 0 : index
    %10 = vector.load %arg5[%c0_9, %c0_10] : memref<1x64xf32, #tpu.memory_space<vmem>>, vector<1x64xf32>
    %11 = vector.broadcast %10 : vector<1x64xf32> to vector<8x64xf32>
    %12 = arith.addf %9, %11 : vector<8x64xf32>
    %cst_11 = arith.constant 0.000000e+00 : f32
    %13 = vector.broadcast %cst_11 : f32 to vector<8x64xf32>
    %14 = arith.maximumf %12, %13 : vector<8x64xf32>
    %c0_12 = arith.constant 0 : index
    %c0_13 = arith.constant 0 : index
    %15 = vector.load %arg6[%c0_12, %c0_13] : memref<1x64xf32, #tpu.memory_space<vmem>>, vector<1x64xf32>
    %16 = vector.broadcast %15 : vector<1x64xf32> to vector<8x64xf32>
    %17 = arith.mulf %14, %16 : vector<8x64xf32>
    %cst_14 = arith.constant dense<0.000000e+00> : vector<8xf32>
    %18 = vector.multi_reduction <add>, %17, %cst_14 [1] : vector<8x64xf32> to vector<8xf32>
    %19 = vector.shape_cast %18 : vector<8xf32> to vector<8x1xf32>
    %c0_15 = arith.constant 0 : index
    %c0_16 = arith.constant 0 : index
    %20 = memref.load %arg7[%c0_15, %c0_16] : memref<1x1xf32, #tpu.memory_space<smem>>
    %21 = vector.broadcast %20 : f32 to vector<8x1xf32>
    %22 = arith.addf %19, %21 : vector<8x1xf32>
    %c0_17 = arith.constant 0 : index
    %c0_18 = arith.constant 0 : index
    %23 = vector.load %arg8[%c0_17, %c0_18] : memref<8x1xf32, #tpu.memory_space<vmem>>, vector<8x1xf32>
    tpu.vector_store %arg8[%c0_17, %c0_18], %22 {strides = array<i32>} : memref<8x1xf32, #tpu.memory_space<vmem>>, vector<8x1xf32>,
    return
  }
  func.func @transform_0(%arg0: i32) -> (i32, i32) {
    %c0_i32 = arith.constant 0 : i32
    %c0_i32_0 = arith.constant 0 : i32
    return %arg0, %c0_i32 : i32, i32
  }
  func.func @transform_1(%arg0: i32) -> (i32, i32) {
    %c0_i32 = arith.constant 0 : i32
    %c0_i32_0 = arith.constant 0 : i32
    %c0_i32_1 = arith.constant 0 : i32
    return %c0_i32, %c0_i32_0 : i32, i32
  }
  func.func @transform_2(%arg0: i32) -> (i32, i32) {
    %c0_i32 = arith.constant 0 : i32
    %c0_i32_0 = arith.constant 0 : i32
    %c0_i32_1 = arith.constant 0 : i32
    return %c0_i32, %c0_i32_0 : i32, i32
  }
  func.func @transform_3(%arg0: i32) -> (i32, i32) {
    %c0_i32 = arith.constant 0 : i32
    %c0_i32_0 = arith.constant 0 : i32
    %c0_i32_1 = arith.constant 0 : i32
    return %c0_i32, %c0_i32_0 : i32, i32
  }
  func.func @transform_4(%arg0: i32) -> (i32, i32) {
    %c0_i32 = arith.constant 0 : i32
    %c0_i32_0 = arith.constant 0 : i32
    %c0_i32_1 = arith.constant 0 : i32
    return %c0_i32, %c0_i32_0 : i32, i32
  }
  func.func @transform_5(%arg0: i32) -> (i32, i32) {
    %c0_i32 = arith.constant 0 : i32
    %c0_i32_0 = arith.constant 0 : i32
    %c0_i32_1 = arith.constant 0 : i32
    return %c0_i32, %c0_i32_0 : i32, i32
  }
  func.func @transform_6(%arg0: i32) -> (i32, i32) {
    %c0_i32 = arith.constant 0 : i32
    %c0_i32_0 = arith.constant 0 : i32
    %c0_i32_1 = arith.constant 0 : i32
    return %c0_i32, %c0_i32_0 : i32, i32
  }
  func.func @transform_7(%arg0: i32) -> (i32, i32) {
    %c0_i32 = arith.constant 0 : i32
    %c0_i32_0 = arith.constant 0 : i32
    return %arg0, %c0_i32 : i32, i32
  }
}

</mosaic_0001>

<bundles_post_ra>
// kernel: tpu_custom_call.1
= control target key start
LH: loop header
LB: loop body
LE: loop exit
PB: predicated region body
PF: predicated region fallthrough
CT: control target
= control target key end

     0   :  { %v355_v0 = vmov 0.0|0.0   ;;  %vm356_vm0 = vmmov 0   ;;  %v357_v4 = vmov 0.0   ;;  %vm137_vm1 = vcmask 523264   ;;  %s488_s1 = inlined_call_operand.vmem [shape: f32[128,64], index: 1, kind: input, shape index: {}]   ;;  %s489_s3 = inlined_call_operand.vmem [shape: f32[64,64], index: 3, kind: input, shape index: {}]   ;;  %s490_s0 = inlined_call_operand.vmem [shape: f32[8,128], index: 0, kind: input, shape index: {}]   ;;  %s491_s2 = inlined_call_operand.vmem [shape: f32[1,64], index: 2, kind: input, shape index: {}]   ;;  %s492_s4 = inlined_call_operand.vmem [shape: f32[1,64], index: 4, kind: input, shape index: {}]   ;;  %s493_s5 = inlined_call_operand.vmem [shape: f32[1,64], index: 5, kind: input, shape index: {}]   ;;  %s494_s6 = inlined_call_operand.<no memory space> [shape: f32[1,1], index: 6, kind: input, shape index: {}]   ;;  %s495_s7 = inlined_call_operand.vmem [shape: f32[8,1], index: 7, kind: output, shape index: {}]  }
   0x1   :  { %316 = vmatprep.subr.bf16.mxu0 %v355_v0  ;;  %v28_v1 = vld [vmem:[%s488_s1] sm:$0xff]  ;;  %v29_v2 = vld [vmem:[%s488_s1 + $0x8] sm:$0xff]  ;;  %v30_v3 = vld [vmem:[%s488_s1 + $0x10] sm:$0xff]  ;;  %294 = vmatprep.mubr.msk.f32.mxu0 %vm356_vm0, %v357_v4  ;;  %v224_v52 = vstv %s494_s6  ;;  %vm226_vm2 = vcmask 7168  }
   0x2   :  { %v317_v5 = vpack.c.bf16 %v29_v2, %v28_v1  ;;  %v31_v6 = vld [vmem:[%s488_s1 + $0x18] sm:$0xff]  ;;  %340 = vmatprep.subr.bf16.mxu1 %v355_v0  ;;  %313 = vmatprep.mubr.msk.f32.mxu1 %vm356_vm0, %v357_v4  ;;  %v32_v8 = vld [vmem:[%s488_s1 + $0x20] sm:$0xff]  ;;  %v33_v9 = vld [vmem:[%s488_s1 + $0x28] sm:$0xff] }
   0x3   :  { %v320_v7 = vpack.c.bf16 %v31_v6, %v30_v3  ;;  %v122_v10 = vld [vmem:[%s489_s3] sm:$0xff]  ;;  %v123_v11 = vld [vmem:[%s489_s3 + $0x8] sm:$0xff]  ;;  %v124_v12 = vld [vmem:[%s489_s3 + $0x10] sm:$0xff]  ;;  %v323_v14 = vpack.c.bf16 %v33_v9, %v32_v8 }
   0x4   :  { %318 = vmatpush3.bf16.msra.mxu0 %v317_v5  ;;  %v125_v13 = vld [vmem:[%s489_s3 + $0x18] sm:$0xff]  ;;  %v341_v15 = vpack.c.bf16 %v123_v11, %v122_v10  ;;  %v34_v16 = vld [vmem:[%s488_s1 + $0x30] sm:$0xff]  ;;  %v126_v19 = vld [vmem:[%s489_s3 + $0x20] sm:$0xff] }
   0x5   :  { %319 = vmatprep.subr.bf16.mxu0 %v355_v0  ;;  %v35_v17 = vld [vmem:[%s488_s1 + $0x38] sm:$0xff]  ;;  %v344_v18 = vpack.c.bf16 %v125_v13, %v124_v12  ;;  %v127_v20 = vld [vmem:[%s489_s3 + $0x28] sm:$0xff]  ;;  %v36_v22 = vld [vmem:[%s488_s1 + $0x40] sm:$0xff] }
   0x6   :  { %342 = vmatpush3.bf16.msra.mxu1 %v341_v15  ;;  %v326_v21 = vpack.c.bf16 %v35_v17, %v34_v16  ;;  %v37_v23 = vld [vmem:[%s488_s1 + $0x48] sm:$0xff]  ;;  %v347_v24 = vpack.c.bf16 %v127_v20, %v126_v19  ;;  %v38_v26 = vld [vmem:[%s488_s1 + $0x50] sm:$0xff]  ;;  %v39_v27 = vld [vmem:[%s488_s1 + $0x58] sm:$0xff] }
   0x7   :  { %343 = vmatprep.subr.bf16.mxu1 %v355_v0  ;;  %v329_v25 = vpack.c.bf16 %v37_v23, %v36_v22  ;;  %v332_v28 = vpack.c.bf16 %v39_v27, %v38_v26  ;;  %v40_v29 = vld [vmem:[%s488_s1 + $0x60] sm:$0xff]  ;;  %v41_v30 = vld [vmem:[%s488_s1 + $0x68] sm:$0xff]  ;;  %v42_v32 = vld [vmem:[%s488_s1 + $0x70] sm:$0xff] }
   0x8   :  { %321 = vmatpush3.bf16.msra.mxu0 %v320_v7  ;;  %v335_v31 = vpack.c.bf16 %v41_v30, %v40_v29  ;;  %v43_v33 = vld [vmem:[%s488_s1 + $0x78] sm:$0xff]  ;;  %v27_v35 = vld [vmem:[%s490_s0] sm:$0xff]  ;;  %v128_v36 = vld [vmem:[%s489_s3 + $0x30] sm:$0xff] }
   0x9   :  { %322 = vmatprep.subr.bf16.mxu0 %v355_v0  ;;  %v338_v34 = vpack.c.bf16 %v43_v33, %v42_v32  ;;  %v129_v37 = vld [vmem:[%s489_s3 + $0x38] sm:$0xff]  ;;  %v232_v39 = vld [vmem:[%s491_s2] ss:$0 sm:$0xff] }
   0xa   :  { %345 = vmatpush3.bf16.msra.mxu1 %v344_v18  ;;  %v350_v38 = vpack.c.bf16 %v129_v37, %v128_v36  ;;  %v233_v44 = vld [vmem:[%s492_s4] ss:$0 sm:$0xff] }
   0xb   :  { %346 = vmatprep.subr.bf16.mxu1 %v355_v0  ;;  %v235_v48 = vld [vmem:[%s493_s5] ss:$0 sm:$0xff] }
   0xc   :  { %324 = vmatpush3.bf16.msra.mxu0 %v323_v14 }
   0xd   :  { %325 = vmatprep.subr.bf16.mxu0 %v355_v0 }
   0xe   :  { %348 = vmatpush3.bf16.msra.mxu1 %v347_v24 }
   0xf   :  { %349 = vmatprep.subr.bf16.mxu1 %v355_v0 }
  0x10   :  { %327 = vmatpush3.bf16.msra.mxu0 %v326_v21 }
  0x11   :  { %328 = vmatprep.subr.bf16.mxu0 %v355_v0 }
  0x12   :  { %351 = vmatpush3.bf16.msra.mxu1 %v350_v38 }
  0x14   :  { %330 = vmatpush3.bf16.msra.mxu0 %v329_v25 }
  0x15   :  { %331 = vmatprep.subr.bf16.mxu0 %v355_v0 }
  0x18   :  { %333 = vmatpush3.bf16.msra.mxu0 %v332_v28 }
  0x19   :  { %334 = vmatprep.subr.bf16.mxu0 %v355_v0 }
  0x1c   :  { %336 = vmatpush3.bf16.msra.mxu0 %v335_v31 }
  0x1d   :  { %337 = vmatprep.subr.bf16.mxu0 %v355_v0 }
  0x20   :  { %339 = vmatpush3.bf16.msra.mxu0 %v338_v34 }
  0x23   :  { %295 = vmatmul.mubr.f32.vlgmr.msra.gmra.mrb[0].mxu0 %v27_v35 }
  0xf6   :  { %v117_v40 = vpop.f32.mrb[0].mxu0 }
  0xf7   :  { %v118_v41 = vadd.f32 %v232_v39, %v117_v40  ;;  %v296_v42 = vpop.f32.mrb[1].mxu0 }
  0xf9   :  { %v121_v43 = vmax.f32 %v118_v41, 0.0 }
  0xfb   :  { %314 = vmatmul.mubr.msk.f32.vlgmr.msra.gmra.mrb[0].mxu1 %vm137_vm1, %v121_v43 }
 0x1ce   :  { %v207_v45 = vpop.f32.mrb[0].mxu1 }
 0x1cf   :  { %v208_v46 = vadd.f32 %v233_v44, %v207_v45  ;;  %v315_v47 = vpop.f32.mrb[1].mxu1 }
 0x1d1   :  { %v211_v49 = vmax.f32 %v208_v46, 0.0 }
 0x1d3   :  { %v219_v50 = vmul.f32 %v235_v48, %v211_v49 }
 0x1d5   :  { %v220_v51 = vsel %vm137_vm1, %v219_v50, 0.0 }
 0x1d6   :  { %221 = vadd.xlane.f32.xlu0 %v220_v51 }
 0x263   :  { %v222_v53 = vpop.xlane.xlu0 %221 }
 0x264   :  { %v225_v54 = vadd.f32 %v224_v52, %v222_v53 }
 0x266   :  { %227 = vst.msk [vmem:[%s495_s7] sm:$0xff] %vm226_vm2, %v225_v54 }

</bundles_post_ra>
